<compile_context>
chip_gen: v7x
topology: tpu7x:2x2x1
jax: 0.10.0
libtpu: 0.0.40
codegen_flags: <defaults>
</compile_context>

<pallas_src>
import functools

import jax
import jax.numpy as jnp
from jax import lax
from jax.experimental import pallas as pl
from jax.experimental.pallas import tpu as pltpu

NUM_CLASSES = 5
EPS = 1e-6
LANE = 128


def _round_up(x, m):
    return ((x + m - 1) // m) * m


def _compound_stats_kernel(logits_ref, tgt_ref,
                           inter_ref, psum_ref, cnt_ref, nll_ref,
                           inter_acc, psum_acc, cnt_acc, nll_acc,
                           *, num_classes, s_blk, tiles_per_split,
                           hw_valid, need_mask):
    """Accumulates per-(batch, split) partial statistics over one (C, S, 128) block.

    Outputs per (n, p), each (C, 1):
      inter_ref : sum_p softmax[c,p] * onehot[c,p]
      psum_ref  : sum_p softmax[c,p]
      cnt_ref   : sum_p onehot[c,p]                 (label counts)
      nll_ref   : sum_{p: tgt_p == c} nll_p         (per-class NLL sums)
    """
    C = num_classes
    S = s_blk
    p = pl.program_id(1)
    i = pl.program_id(2)
    last = pl.num_programs(2) - 1

    @pl.when(i == 0)
    def _init():
        inter_acc[...] = jnp.zeros_like(inter_acc)
        psum_acc[...] = jnp.zeros_like(psum_acc)
        cnt_acc[...] = jnp.zeros_like(cnt_acc)
        nll_acc[...] = jnp.zeros_like(nll_acc)

    logits = logits_ref[...].astype(jnp.float32)          # (C, S, 128)
    tgt = tgt_ref[...].astype(jnp.int32)                  # (S, 128)
    lg = [logits[c] for c in range(C)]                    # C dense (S, 128) planes

    if need_mask:
        sub = lax.broadcasted_iota(jnp.int32, (S, LANE), 0)
        ln = lax.broadcasted_iota(jnp.int32, (S, LANE), 1)
        tile = p * tiles_per_split + i                    # un-clamped logical tile id
        pix = (tile * S + sub) * LANE + ln                # global pixel index
        valid_b = pix < hw_valid                          # (S, 128) bool
        valid_f = valid_b.astype(jnp.float32)
        # Keep garbage out of the exp/log path so masked summands are finite * 0.
        lg = [jnp.where(valid_b, x, 0.0) for x in lg]

    # ---- numerically-stable softmax / log-softmax over the unrolled class axis
    m = lg[0]
    for c in range(1, C):
        m = jnp.maximum(m, lg[c])                         # (S, 128)
    e = [jnp.exp(x - m) for x in lg]                      # single exp per class plane
    se = e[0]
    for c in range(1, C):
        se = se + e[c]
    inv_se = 1.0 / se                                     # exact divide: holds 1e-5 tol
    lse = m + jnp.log(se)                                 # (S, 128)

    def fold(x):
        # (S, 128) -> (fold_rows, 128) using only full-vreg VALU adds (no XLU).
        if S % 8 != 0 or S <= 8:
            return x
        xr = x.reshape(S // 8, 8, LANE)                   # layout-preserving view
        parts = [xr[k] for k in range(S // 8)]
        while len(parts) > 1:
            nxt = [a + b for a, b in zip(parts[0::2], parts[1::2])]
            if len(parts) % 2:
                nxt.append(parts[-1])
            parts = nxt
        return parts[0]

    # one-hot via per-class compares (no (C, T) iota/one-hot materialization)
    oh_list = []
    logit_tgt = jnp.zeros((S, LANE), jnp.float32)
    for c in range(C):
        oh_b = tgt == c
        if need_mask:
            oh_b = jnp.logical_and(oh_b, valid_b)
        oh_list.append(oh_b)
        logit_tgt = jnp.where(oh_b, lg[c], logit_tgt)
    nll = lse - logit_tgt                                 # -log p[target] per pixel

    for c in range(C):
        oh = oh_list[c].astype(jnp.float32)               # (S, 128)
        ps = e[c] * inv_se                                # softmax prob of class c
        inter_acc[c] += fold(ps * oh)
        if need_mask:
            psum_acc[c] += fold(ps * valid_f)             # padded lanes must not count
        else:
            psum_acc[c] += fold(ps)
        cnt_acc[c] += fold(oh)
        nll_acc[c] += fold(nll * oh)

    @pl.when(i == last)
    def _flush():
        # Deferred cross-lane reduction + narrow (C, 1) store, once per sweep.
        inter_ref[...] = jnp.sum(jnp.sum(inter_acc[...], axis=2), axis=1, keepdims=True)
        psum_ref[...] = jnp.sum(jnp.sum(psum_acc[...], axis=2), axis=1, keepdims=True)
        cnt_ref[...] = jnp.sum(jnp.sum(cnt_acc[...], axis=2), axis=1, keepdims=True)
        nll_ref[...] = jnp.sum(jnp.sum(nll_acc[...], axis=2), axis=1, keepdims=True)


def compound_loss(out_nchw, tgt_nhw, class_weights=None, ce_weight=0.2,
                  tile_pixels=32768, num_splits=2):
    """out_nchw: [N, C, H, W] float logits; tgt_nhw: [N, H, W] int labels."""
    N, C, H, W = out_nchw.shape
    HW = H * W

    # ---- pixel re-layout: [N, C, H, W] -> [N, C, HW//128, 128]; free when HW % 128 == 0
    if HW % LANE != 0:
        # TODO(synk): non-128-divisible images pay one padding pass over the logits here.
        pad = _round_up(HW, LANE) - HW
        logits_flat = jnp.pad(out_nchw.reshape(N, C, HW), ((0, 0), (0, 0), (0, pad)))
        tgt_flat = jnp.pad(tgt_nhw.reshape(N, HW), ((0, 0), (0, pad)))
    else:
        logits_flat = out_nchw.reshape(N, C, HW)
        tgt_flat = tgt_nhw.reshape(N, HW)
    s_total = logits_flat.shape[-1] // LANE

    logits_v = logits_flat.reshape(N, C, s_total, LANE)
    # int8/uint8 labels would force (32, 128) sublane tiling on the target blocks,
    # conflicting with the 8-row block granularity below -> upcast to int32 here.
    tgt_v = tgt_flat.reshape(N, s_total, LANE).astype(jnp.int32)

    # ---- sublane block size: large (amortize ~0.35 us/step), multiple of the dtype's
    #      sublane granularity, preferring an exact divisor of s_total (no edge mask).
    gran = {4: 8, 2: 16, 1: 32}.get(jnp.dtype(out_nchw.dtype).itemsize, 8)
    s_target = max(gran, (int(tile_pixels) // LANE) // gran * gran)
    if s_total <= s_target:
        s_blk = s_total
    else:
        s_blk = 0
        d = s_target
        while d >= gran:
            if s_total % d == 0:
                s_blk = d
                break
            d -= gran
        if s_blk == 0 or s_blk * 4 < s_target:
            s_blk = s_target                      # fall back to a masked edge block
    n_tiles = pl.cdiv(s_total, s_blk)

    # ---- explicit parallel split so a v7x megacore is busy even when N == 1
    P = max(1, min(int(num_splits), n_tiles))
    tiles_per_split = pl.cdiv(n_tiles, P)
    covered = P * tiles_per_split * s_blk * LANE
    need_mask = covered != HW

    fold_rows = 8 if (s_blk % 8 == 0 and s_blk > 8) else s_blk

    kernel = functools.partial(
        _compound_stats_kernel,
        num_classes=C, s_blk=s_blk, tiles_per_split=tiles_per_split,
        hw_valid=HW, need_mask=need_mask)

    def _logits_imap(n, p, i):
        t = jnp.minimum(p * tiles_per_split + i, n_tiles - 1)  # clamp fully-OOB blocks
        return (n, 0, t, 0)

    def _tgt_imap(n, p, i):
        t = jnp.minimum(p * tiles_per_split + i, n_tiles - 1)
        return (n, t, 0)

    def _out_imap(n, p, i):
        return (n, p, 0, 0)

    out_shapes = tuple(jax.ShapeDtypeStruct((N, P, C, 1), jnp.float32) for _ in range(4))
    out_spec = pl.BlockSpec((pl.Squeezed(), pl.Squeezed(), C, 1), _out_imap)

    inter_o, psum_o, cnt_o, nll_o = pl.pallas_call(
        kernel,
        out_shape=out_shapes,
        grid_spec=pltpu.PrefetchScalarGridSpec(
            num_scalar_prefetch=0,
            grid=(N, P, tiles_per_split),
            in_specs=[
                pl.BlockSpec((pl.Squeezed(), C, s_blk, LANE), _logits_imap),
                pl.BlockSpec((pl.Squeezed(), s_blk, LANE), _tgt_imap),
            ],
            out_specs=(out_spec,) * 4,
            scratch_shapes=[pltpu.VMEM((C, fold_rows, LANE), jnp.float32)
                            for _ in range(4)],
        ),
        compiler_params=pltpu.CompilerParams(
            dimension_semantics=("parallel", "parallel", "arbitrary")),
    )(logits_v, tgt_v)

    # ---- tiny (C,)-sized epilogue in plain JAX: per-class partials -> scalar loss
    inter = jnp.sum(inter_o, axis=(0, 1, 3))      # (C,)
    psum = jnp.sum(psum_o, axis=(0, 1, 3))
    cnt = jnp.sum(cnt_o, axis=(0, 1, 3))
    nllsum = jnp.sum(nll_o, axis=(0, 1, 3))

    union = psum + cnt
    dice = (2.0 * inter + EPS) / (union + EPS)
    dice_l = 1.0 - jnp.mean(dice)

    if class_weights is None:
        cw = jnp.ones((C,), jnp.float32)          # unweighted CE == weight 1 per class
    else:
        cw = jnp.asarray(class_weights, jnp.float32).reshape(C)
    # torch CrossEntropyLoss(weight=w, reduction='mean'):
    #   sum_p w[tgt_p] * nll_p / sum_p w[tgt_p] == sum_c w_c*nllsum_c / sum_c w_c*cnt_c
    ce_l = jnp.dot(cw, nllsum) / jnp.dot(cw, cnt)

    return ce_weight * ce_l + (1.0 - ce_weight) * dice_l


def _reference_loss(out_nchw, tgt_nhw, class_weights, ce_weight):
    logits = out_nchw.astype(jnp.float32)
    C = logits.shape[1]
    logp = jax.nn.log_softmax(logits, axis=1)
    oh = jnp.transpose(jax.nn.one_hot(tgt_nhw, C, dtype=jnp.float32), (0, 3, 1, 2))
    nll = -jnp.sum(logp * oh, axis=1)                      # (N, H, W)
    wt = class_weights[tgt_nhw]
    ce_l = jnp.sum(nll * wt) / jnp.sum(wt)
    ps = jax.nn.softmax(logits, axis=1)
    inter = jnp.sum(ps * oh, axis=(0, 2, 3))
    union = jnp.sum(ps, axis=(0, 2, 3)) + jnp.sum(oh, axis=(0, 2, 3))
    dice_l = 1.0 - jnp.mean((2.0 * inter + EPS) / (union + EPS))
    return ce_weight * ce_l + (1.0 - ce_weight) * dice_l


if __name__ == "__main__":
    key = jax.random.PRNGKey(0)
    k_data, k_w = jax.random.split(key)

    C = NUM_CLASSES
    ce_weight = 0.2

    # deterministic class weights, normalized as in the original script
    raw_w = jax.random.uniform(k_w, (C,), minval=0.5, maxval=2.0)
    class_weights = raw_w / jnp.sum(raw_w) * C

    configs = [
        # (N, H, W, wrapper kwargs)                         exercised paths
        (2, 16, 16, {}),                                    # single block / image
        (1, 40, 36, dict(tile_pixels=1024)),                # pad + edge mask + 2-way split
        (1, 64, 64, dict(tile_pixels=2048, num_splits=1)),  # multi-step accumulation + fold
    ]

    for idx, (N, H, W, kw) in enumerate(configs):
        k_l, k_t = jax.random.split(jax.random.fold_in(k_data, idx))
        out = jax.random.normal(k_l, (N, C, H, W), dtype=jnp.float32)
        tgt = jax.random.randint(k_t, (N, H, W), 0, C, dtype=jnp.int32)

        # use_weighted_ce=False path (module default) and use_weighted_ce=True path
        loss_u = compound_loss(out, tgt, None, ce_weight, **kw)
        loss_w = compound_loss(out, tgt, class_weights, ce_weight, **kw)
        jax.block_until_ready((loss_u, loss_w))

        ref_u = _reference_loss(out, tgt, jnp.ones((C,), jnp.float32), ce_weight)
        ref_w = _reference_loss(out, tgt, class_weights, ce_weight)

        assert jnp.allclose(loss_u, ref_u, rtol=1e-5, atol=1e-5), (idx, loss_u, ref_u)
        assert jnp.allclose(loss_w, ref_w, rtol=1e-5, atol=1e-5), (idx, loss_w, ref_w)

    print("KERNEL_OK")
</pallas_src>

<mosaic_0001>
module attributes {stable_mosaic.version = 11 : i64} {
  func.func @_compound_stats_kernel(%arg0: i32, %arg1: i32, %arg2: i32, %arg3: memref<1x5x2x128xf32, #tpu.memory_space<vmem>>, %arg4: memref<1x2x128xi32, #tpu.memory_space<vmem>>, %arg5: memref<1x1x5x1xf32, #tpu.memory_space<vmem>>, %arg6: memref<1x1x5x1xf32, #tpu.memory_space<vmem>>, %arg7: memref<1x1x5x1xf32, #tpu.memory_space<vmem>>, %arg8: memref<1x1x5x1xf32, #tpu.memory_space<vmem>>, %arg9: memref<5x2x128xf32, #tpu.memory_space<vmem>>, %arg10: memref<5x2x128xf32, #tpu.memory_space<vmem>>, %arg11: memref<5x2x128xf32, #tpu.memory_space<vmem>>, %arg12: memref<5x2x128xf32, #tpu.memory_space<vmem>>) attributes {dimension_semantics = [#tpu.dimension_semantics<parallel>, #tpu.dimension_semantics<parallel>, #tpu.dimension_semantics<arbitrary>], iteration_bounds = array<i64: 2, 1, 1>, scalar_prefetch = 0 : i64, scratch_operands = 4 : i64, tpu.core_type = #tpu.core_type<tc>, window_params = [{transform_indices = @transform_0, window_bounds = array<i64: 1, 5, 2, 128>}, {transform_indices = @transform_1, window_bounds = array<i64: 1, 2, 128>}, {transform_indices = @transform_2, window_bounds = array<i64: 1, 1, 5, 1>}, {transform_indices = @transform_3, window_bounds = array<i64: 1, 1, 5, 1>}, {transform_indices = @transform_4, window_bounds = array<i64: 1, 1, 5, 1>}, {transform_indices = @transform_5, window_bounds = array<i64: 1, 1, 5, 1>}]} {
    %c0_i32 = arith.constant 0 : i32
    %0 = arith.cmpi eq, %arg2, %c0_i32 : i32
    %1 = arith.extui %0 : i1 to i32
    %c0_i32_0 = arith.constant 0 : i32
    %2 = arith.cmpi ne, %1, %c0_i32_0 : i32
    scf.if %2 {
      %cst_127 = arith.constant 0.000000e+00 : f32
      %204 = vector.broadcast %cst_127 : f32 to vector<5x2x128xf32>
      %c0_128 = arith.constant 0 : index
      %c0_129 = arith.constant 0 : index
      %c0_130 = arith.constant 0 : index
      %205 = vector.load %arg9[%c0_128, %c0_129, %c0_130] : memref<5x2x128xf32, #tpu.memory_space<vmem>>, vector<5x2x128xf32>
      tpu.vector_store %arg9[%c0_128, %c0_129, %c0_130], %204 {strides = array<i32>} : memref<5x2x128xf32, #tpu.memory_space<vmem>>, vector<5x2x128xf32>,
      %cst_131 = arith.constant 0.000000e+00 : f32
      %206 = vector.broadcast %cst_131 : f32 to vector<5x2x128xf32>
      %c0_132 = arith.constant 0 : index
      %c0_133 = arith.constant 0 : index
      %c0_134 = arith.constant 0 : index
      %207 = vector.load %arg10[%c0_132, %c0_133, %c0_134] : memref<5x2x128xf32, #tpu.memory_space<vmem>>, vector<5x2x128xf32>
      tpu.vector_store %arg10[%c0_132, %c0_133, %c0_134], %206 {strides = array<i32>} : memref<5x2x128xf32, #tpu.memory_space<vmem>>, vector<5x2x128xf32>,
      %cst_135 = arith.constant 0.000000e+00 : f32
      %208 = vector.broadcast %cst_135 : f32 to vector<5x2x128xf32>
      %c0_136 = arith.constant 0 : index
      %c0_137 = arith.constant 0 : index
      %c0_138 = arith.constant 0 : index
      %209 = vector.load %arg11[%c0_136, %c0_137, %c0_138] : memref<5x2x128xf32, #tpu.memory_space<vmem>>, vector<5x2x128xf32>
      tpu.vector_store %arg11[%c0_136, %c0_137, %c0_138], %208 {strides = array<i32>} : memref<5x2x128xf32, #tpu.memory_space<vmem>>, vector<5x2x128xf32>,
      %cst_139 = arith.constant 0.000000e+00 : f32
      %210 = vector.broadcast %cst_139 : f32 to vector<5x2x128xf32>
      %c0_140 = arith.constant 0 : index
      %c0_141 = arith.constant 0 : index
      %c0_142 = arith.constant 0 : index
      %211 = vector.load %arg12[%c0_140, %c0_141, %c0_142] : memref<5x2x128xf32, #tpu.memory_space<vmem>>, vector<5x2x128xf32>
      tpu.vector_store %arg12[%c0_140, %c0_141, %c0_142], %210 {strides = array<i32>} : memref<5x2x128xf32, #tpu.memory_space<vmem>>, vector<5x2x128xf32>,
    } else {
    }
    %c0 = arith.constant 0 : index
    %c0_1 = arith.constant 0 : index
    %c0_2 = arith.constant 0 : index
    %c0_3 = arith.constant 0 : index
    %3 = vector.load %arg3[%c0, %c0_1, %c0_2, %c0_3] : memref<1x5x2x128xf32, #tpu.memory_space<vmem>>, vector<1x5x2x128xf32>
    %4 = vector.shape_cast %3 : vector<1x5x2x128xf32> to vector<5x2x128xf32>
    %c0_4 = arith.constant 0 : index
    %c0_5 = arith.constant 0 : index
    %c0_6 = arith.constant 0 : index
    %5 = vector.load %arg4[%c0_4, %c0_5, %c0_6] : memref<1x2x128xi32, #tpu.memory_space<vmem>>, vector<1x2x128xi32>
    %6 = vector.shape_cast %5 : vector<1x2x128xi32> to vector<2x128xi32>
    %7 = vector.extract_strided_slice %4 {offsets = [0, 0, 0], sizes = [1, 2, 128], strides = [1, 1, 1]} : vector<5x2x128xf32> to vector<1x2x128xf32>
    %8 = vector.shape_cast %7 : vector<1x2x128xf32> to vector<2x128xf32>
    %9 = vector.extract_strided_slice %4 {offsets = [1, 0, 0], sizes = [1, 2, 128], strides = [1, 1, 1]} : vector<5x2x128xf32> to vector<1x2x128xf32>
    %10 = vector.shape_cast %9 : vector<1x2x128xf32> to vector<2x128xf32>
    %11 = vector.extract_strided_slice %4 {offsets = [2, 0, 0], sizes = [1, 2, 128], strides = [1, 1, 1]} : vector<5x2x128xf32> to vector<1x2x128xf32>
    %12 = vector.shape_cast %11 : vector<1x2x128xf32> to vector<2x128xf32>
    %13 = vector.extract_strided_slice %4 {offsets = [3, 0, 0], sizes = [1, 2, 128], strides = [1, 1, 1]} : vector<5x2x128xf32> to vector<1x2x128xf32>
    %14 = vector.shape_cast %13 : vector<1x2x128xf32> to vector<2x128xf32>
    %15 = vector.extract_strided_slice %4 {offsets = [4, 0, 0], sizes = [1, 2, 128], strides = [1, 1, 1]} : vector<5x2x128xf32> to vector<1x2x128xf32>
    %16 = vector.shape_cast %15 : vector<1x2x128xf32> to vector<2x128xf32>
    %17 = arith.maximumf %8, %10 : vector<2x128xf32>
    %18 = arith.maximumf %17, %12 : vector<2x128xf32>
    %19 = arith.maximumf %18, %14 : vector<2x128xf32>
    %20 = arith.maximumf %19, %16 : vector<2x128xf32>
    %21 = arith.subf %8, %20 : vector<2x128xf32>
    %22 = math.exp %21 : vector<2x128xf32>
    %23 = arith.subf %10, %20 : vector<2x128xf32>
    %24 = math.exp %23 : vector<2x128xf32>
    %25 = arith.subf %12, %20 : vector<2x128xf32>
    %26 = math.exp %25 : vector<2x128xf32>
    %27 = arith.subf %14, %20 : vector<2x128xf32>
    %28 = math.exp %27 : vector<2x128xf32>
    %29 = arith.subf %16, %20 : vector<2x128xf32>
    %30 = math.exp %29 : vector<2x128xf32>
    %31 = arith.addf %22, %24 : vector<2x128xf32>
    %32 = arith.addf %31, %26 : vector<2x128xf32>
    %33 = arith.addf %32, %28 : vector<2x128xf32>
    %34 = arith.addf %33, %30 : vector<2x128xf32>
    %cst = arith.constant 1.000000e+00 : f32
    %35 = vector.broadcast %cst : f32 to vector<2x128xf32>
    %36 = arith.divf %35, %34 : vector<2x128xf32>
    %37 = math.log %34 : vector<2x128xf32>
    %38 = arith.addf %20, %37 : vector<2x128xf32>
    %cst_7 = arith.constant 0.000000e+00 : f32
    %39 = vector.broadcast %cst_7 : f32 to vector<2x128xf32>
    %c0_i32_8 = arith.constant 0 : i32
    %40 = vector.broadcast %c0_i32_8 : i32 to vector<2x128xi32>
    %41 = arith.cmpi eq, %6, %40 : vector<2x128xi32>
    %42 = arith.select %41, %8, %39 : vector<2x128xi1>, vector<2x128xf32>
    %c1_i32 = arith.constant 1 : i32
    %43 = vector.broadcast %c1_i32 : i32 to vector<2x128xi32>
    %44 = arith.cmpi eq, %6, %43 : vector<2x128xi32>
    %45 = arith.select %44, %10, %42 : vector<2x128xi1>, vector<2x128xf32>
    %c2_i32 = arith.constant 2 : i32
    %46 = vector.broadcast %c2_i32 : i32 to vector<2x128xi32>
    %47 = arith.cmpi eq, %6, %46 : vector<2x128xi32>
    %48 = arith.select %47, %12, %45 : vector<2x128xi1>, vector<2x128xf32>
    %c3_i32 = arith.constant 3 : i32
    %49 = vector.broadcast %c3_i32 : i32 to vector<2x128xi32>
    %50 = arith.cmpi eq, %6, %49 : vector<2x128xi32>
    %51 = arith.select %50, %14, %48 : vector<2x128xi1>, vector<2x128xf32>
    %c4_i32 = arith.constant 4 : i32
    %52 = vector.broadcast %c4_i32 : i32 to vector<2x128xi32>
    %53 = arith.cmpi eq, %6, %52 : vector<2x128xi32>
    %54 = arith.select %53, %16, %51 : vector<2x128xi1>, vector<2x128xf32>
    %55 = arith.subf %38, %54 : vector<2x128xf32>
    %56 = arith.extui %41 : vector<2x128xi1> to vector<2x128xi32>
    %57 = arith.sitofp %56 : vector<2x128xi32> to vector<2x128xf32>
    %58 = arith.mulf %22, %36 : vector<2x128xf32>
    %c0_9 = arith.constant 0 : index
    %c0_10 = arith.constant 0 : index
    %c0_11 = arith.constant 0 : index
    %59 = vector.load %arg9[%c0_9, %c0_10, %c0_11] : memref<5x2x128xf32, #tpu.memory_space<vmem>>, vector<1x2x128xf32>
    %60 = vector.shape_cast %59 : vector<1x2x128xf32> to vector<2x128xf32>
    %61 = arith.mulf %58, %57 : vector<2x128xf32>
    %62 = arith.addf %60, %61 : vector<2x128xf32>
    %c0_12 = arith.constant 0 : index
    %c0_13 = arith.constant 0 : index
    %c0_14 = arith.constant 0 : index
    %63 = vector.load %arg9[%c0_12, %c0_13, %c0_14] : memref<5x2x128xf32, #tpu.memory_space<vmem>>, vector<1x2x128xf32>
    %64 = vector.shape_cast %63 : vector<1x2x128xf32> to vector<2x128xf32>
    %65 = vector.shape_cast %62 : vector<2x128xf32> to vector<1x2x128xf32>
    tpu.vector_store %arg9[%c0_12, %c0_13, %c0_14], %65 {strides = array<i32>} : memref<5x2x128xf32, #tpu.memory_space<vmem>>, vector<1x2x128xf32>,
    %c0_15 = arith.constant 0 : index
    %c0_16 = arith.constant 0 : index
    %c0_17 = arith.constant 0 : index
    %66 = vector.load %arg10[%c0_15, %c0_16, %c0_17] : memref<5x2x128xf32, #tpu.memory_space<vmem>>, vector<1x2x128xf32>
    %67 = vector.shape_cast %66 : vector<1x2x128xf32> to vector<2x128xf32>
    %68 = arith.addf %67, %58 : vector<2x128xf32>
    %c0_18 = arith.constant 0 : index
    %c0_19 = arith.constant 0 : index
    %c0_20 = arith.constant 0 : index
    %69 = vector.load %arg10[%c0_18, %c0_19, %c0_20] : memref<5x2x128xf32, #tpu.memory_space<vmem>>, vector<1x2x128xf32>
    %70 = vector.shape_cast %69 : vector<1x2x128xf32> to vector<2x128xf32>
    %71 = vector.shape_cast %68 : vector<2x128xf32> to vector<1x2x128xf32>
    tpu.vector_store %arg10[%c0_18, %c0_19, %c0_20], %71 {strides = array<i32>} : memref<5x2x128xf32, #tpu.memory_space<vmem>>, vector<1x2x128xf32>,
    %c0_21 = arith.constant 0 : index
    %c0_22 = arith.constant 0 : index
    %c0_23 = arith.constant 0 : index
    %72 = vector.load %arg11[%c0_21, %c0_22, %c0_23] : memref<5x2x128xf32, #tpu.memory_space<vmem>>, vector<1x2x128xf32>
    %73 = vector.shape_cast %72 : vector<1x2x128xf32> to vector<2x128xf32>
    %74 = arith.addf %73, %57 : vector<2x128xf32>
    %c0_24 = arith.constant 0 : index
    %c0_25 = arith.constant 0 : index
    %c0_26 = arith.constant 0 : index
    %75 = vector.load %arg11[%c0_24, %c0_25, %c0_26] : memref<5x2x128xf32, #tpu.memory_space<vmem>>, vector<1x2x128xf32>
    %76 = vector.shape_cast %75 : vector<1x2x128xf32> to vector<2x128xf32>
    %77 = vector.shape_cast %74 : vector<2x128xf32> to vector<1x2x128xf32>
    tpu.vector_store %arg11[%c0_24, %c0_25, %c0_26], %77 {strides = array<i32>} : memref<5x2x128xf32, #tpu.memory_space<vmem>>, vector<1x2x128xf32>,
    %c0_27 = arith.constant 0 : index
    %c0_28 = arith.constant 0 : index
    %c0_29 = arith.constant 0 : index
    %78 = vector.load %arg12[%c0_27, %c0_28, %c0_29] : memref<5x2x128xf32, #tpu.memory_space<vmem>>, vector<1x2x128xf32>
    %79 = vector.shape_cast %78 : vector<1x2x128xf32> to vector<2x128xf32>
    %80 = arith.mulf %55, %57 : vector<2x128xf32>
    %81 = arith.addf %79, %80 : vector<2x128xf32>
    %c0_30 = arith.constant 0 : index
    %c0_31 = arith.constant 0 : index
    %c0_32 = arith.constant 0 : index
    %82 = vector.load %arg12[%c0_30, %c0_31, %c0_32] : memref<5x2x128xf32, #tpu.memory_space<vmem>>, vector<1x2x128xf32>
    %83 = vector.shape_cast %82 : vector<1x2x128xf32> to vector<2x128xf32>
    %84 = vector.shape_cast %81 : vector<2x128xf32> to vector<1x2x128xf32>
    tpu.vector_store %arg12[%c0_30, %c0_31, %c0_32], %84 {strides = array<i32>} : memref<5x2x128xf32, #tpu.memory_space<vmem>>, vector<1x2x128xf32>,
    %85 = arith.extui %44 : vector<2x128xi1> to vector<2x128xi32>
    %86 = arith.sitofp %85 : vector<2x128xi32> to vector<2x128xf32>
    %87 = arith.mulf %24, %36 : vector<2x128xf32>
    %c1 = arith.constant 1 : index
    %c0_33 = arith.constant 0 : index
    %c0_34 = arith.constant 0 : index
    %88 = vector.load %arg9[%c1, %c0_33, %c0_34] : memref<5x2x128xf32, #tpu.memory_space<vmem>>, vector<1x2x128xf32>
    %89 = vector.shape_cast %88 : vector<1x2x128xf32> to vector<2x128xf32>
    %90 = arith.mulf %87, %86 : vector<2x128xf32>
    %91 = arith.addf %89, %90 : vector<2x128xf32>
    %c1_35 = arith.constant 1 : index
    %c0_36 = arith.constant 0 : index
    %c0_37 = arith.constant 0 : index
    %92 = vector.load %arg9[%c1_35, %c0_36, %c0_37] : memref<5x2x128xf32, #tpu.memory_space<vmem>>, vector<1x2x128xf32>
    %93 = vector.shape_cast %92 : vector<1x2x128xf32> to vector<2x128xf32>
    %94 = vector.shape_cast %91 : vector<2x128xf32> to vector<1x2x128xf32>
    tpu.vector_store %arg9[%c1_35, %c0_36, %c0_37], %94 {strides = array<i32>} : memref<5x2x128xf32, #tpu.memory_space<vmem>>, vector<1x2x128xf32>,
    %c1_38 = arith.constant 1 : index
    %c0_39 = arith.constant 0 : index
    %c0_40 = arith.constant 0 : index
    %95 = vector.load %arg10[%c1_38, %c0_39, %c0_40] : memref<5x2x128xf32, #tpu.memory_space<vmem>>, vector<1x2x128xf32>
    %96 = vector.shape_cast %95 : vector<1x2x128xf32> to vector<2x128xf32>
    %97 = arith.addf %96, %87 : vector<2x128xf32>
    %c1_41 = arith.constant 1 : index
    %c0_42 = arith.constant 0 : index
    %c0_43 = arith.constant 0 : index
    %98 = vector.load %arg10[%c1_41, %c0_42, %c0_43] : memref<5x2x128xf32, #tpu.memory_space<vmem>>, vector<1x2x128xf32>
    %99 = vector.shape_cast %98 : vector<1x2x128xf32> to vector<2x128xf32>
    %100 = vector.shape_cast %97 : vector<2x128xf32> to vector<1x2x128xf32>
    tpu.vector_store %arg10[%c1_41, %c0_42, %c0_43], %100 {strides = array<i32>} : memref<5x2x128xf32, #tpu.memory_space<vmem>>, vector<1x2x128xf32>,
    %c1_44 = arith.constant 1 : index
    %c0_45 = arith.constant 0 : index
    %c0_46 = arith.constant 0 : index
    %101 = vector.load %arg11[%c1_44, %c0_45, %c0_46] : memref<5x2x128xf32, #tpu.memory_space<vmem>>, vector<1x2x128xf32>
    %102 = vector.shape_cast %101 : vector<1x2x128xf32> to vector<2x128xf32>
    %103 = arith.addf %102, %86 : vector<2x128xf32>
    %c1_47 = arith.constant 1 : index
    %c0_48 = arith.constant 0 : index
    %c0_49 = arith.constant 0 : index
    %104 = vector.load %arg11[%c1_47, %c0_48, %c0_49] : memref<5x2x128xf32, #tpu.memory_space<vmem>>, vector<1x2x128xf32>
    %105 = vector.shape_cast %104 : vector<1x2x128xf32> to vector<2x128xf32>
    %106 = vector.shape_cast %103 : vector<2x128xf32> to vector<1x2x128xf32>
    tpu.vector_store %arg11[%c1_47, %c0_48, %c0_49], %106 {strides = array<i32>} : memref<5x2x128xf32, #tpu.memory_space<vmem>>, vector<1x2x128xf32>,
    %c1_50 = arith.constant 1 : index
    %c0_51 = arith.constant 0 : index
    %c0_52 = arith.constant 0 : index
    %107 = vector.load %arg12[%c1_50, %c0_51, %c0_52] : memref<5x2x128xf32, #tpu.memory_space<vmem>>, vector<1x2x128xf32>
    %108 = vector.shape_cast %107 : vector<1x2x128xf32> to vector<2x128xf32>
    %109 = arith.mulf %55, %86 : vector<2x128xf32>
    %110 = arith.addf %108, %109 : vector<2x128xf32>
    %c1_53 = arith.constant 1 : index
    %c0_54 = arith.constant 0 : index
    %c0_55 = arith.constant 0 : index
    %111 = vector.load %arg12[%c1_53, %c0_54, %c0_55] : memref<5x2x128xf32, #tpu.memory_space<vmem>>, vector<1x2x128xf32>
    %112 = vector.shape_cast %111 : vector<1x2x128xf32> to vector<2x128xf32>
    %113 = vector.shape_cast %110 : vector<2x128xf32> to vector<1x2x128xf32>
    tpu.vector_store %arg12[%c1_53, %c0_54, %c0_55], %113 {strides = array<i32>} : memref<5x2x128xf32, #tpu.memory_space<vmem>>, vector<1x2x128xf32>,
    %114 = arith.extui %47 : vector<2x128xi1> to vector<2x128xi32>
    %115 = arith.sitofp %114 : vector<2x128xi32> to vector<2x128xf32>
    %116 = arith.mulf %26, %36 : vector<2x128xf32>
    %c2 = arith.constant 2 : index
    %c0_56 = arith.constant 0 : index
    %c0_57 = arith.constant 0 : index
    %117 = vector.load %arg9[%c2, %c0_56, %c0_57] : memref<5x2x128xf32, #tpu.memory_space<vmem>>, vector<1x2x128xf32>
    %118 = vector.shape_cast %117 : vector<1x2x128xf32> to vector<2x128xf32>
    %119 = arith.mulf %116, %115 : vector<2x128xf32>
    %120 = arith.addf %118, %119 : vector<2x128xf32>
    %c2_58 = arith.constant 2 : index
    %c0_59 = arith.constant 0 : index
    %c0_60 = arith.constant 0 : index
    %121 = vector.load %arg9[%c2_58, %c0_59, %c0_60] : memref<5x2x128xf32, #tpu.memory_space<vmem>>, vector<1x2x128xf32>
    %122 = vector.shape_cast %121 : vector<1x2x128xf32> to vector<2x128xf32>
    %123 = vector.shape_cast %120 : vector<2x128xf32> to vector<1x2x128xf32>
    tpu.vector_store %arg9[%c2_58, %c0_59, %c0_60], %123 {strides = array<i32>} : memref<5x2x128xf32, #tpu.memory_space<vmem>>, vector<1x2x128xf32>,
    %c2_61 = arith.constant 2 : index
    %c0_62 = arith.constant 0 : index
    %c0_63 = arith.constant 0 : index
    %124 = vector.load %arg10[%c2_61, %c0_62, %c0_63] : memref<5x2x128xf32, #tpu.memory_space<vmem>>, vector<1x2x128xf32>
    %125 = vector.shape_cast %124 : vector<1x2x128xf32> to vector<2x128xf32>
    %126 = arith.addf %125, %116 : vector<2x128xf32>
    %c2_64 = arith.constant 2 : index
    %c0_65 = arith.constant 0 : index
    %c0_66 = arith.constant 0 : index
    %127 = vector.load %arg10[%c2_64, %c0_65, %c0_66] : memref<5x2x128xf32, #tpu.memory_space<vmem>>, vector<1x2x128xf32>
    %128 = vector.shape_cast %127 : vector<1x2x128xf32> to vector<2x128xf32>
    %129 = vector.shape_cast %126 : vector<2x128xf32> to vector<1x2x128xf32>
    tpu.vector_store %arg10[%c2_64, %c0_65, %c0_66], %129 {strides = array<i32>} : memref<5x2x128xf32, #tpu.memory_space<vmem>>, vector<1x2x128xf32>,
    %c2_67 = arith.constant 2 : index
    %c0_68 = arith.constant 0 : index
    %c0_69 = arith.constant 0 : index
    %130 = vector.load %arg11[%c2_67, %c0_68, %c0_69] : memref<5x2x128xf32, #tpu.memory_space<vmem>>, vector<1x2x128xf32>
    %131 = vector.shape_cast %130 : vector<1x2x128xf32> to vector<2x128xf32>
    %132 = arith.addf %131, %115 : vector<2x128xf32>
    %c2_70 = arith.constant 2 : index
    %c0_71 = arith.constant 0 : index
    %c0_72 = arith.constant 0 : index
    %133 = vector.load %arg11[%c2_70, %c0_71, %c0_72] : memref<5x2x128xf32, #tpu.memory_space<vmem>>, vector<1x2x128xf32>
    %134 = vector.shape_cast %133 : vector<1x2x128xf32> to vector<2x128xf32>
    %135 = vector.shape_cast %132 : vector<2x128xf32> to vector<1x2x128xf32>
    tpu.vector_store %arg11[%c2_70, %c0_71, %c0_72], %135 {strides = array<i32>} : memref<5x2x128xf32, #tpu.memory_space<vmem>>, vector<1x2x128xf32>,
    %c2_73 = arith.constant 2 : index
    %c0_74 = arith.constant 0 : index
    %c0_75 = arith.constant 0 : index
    %136 = vector.load %arg12[%c2_73, %c0_74, %c0_75] : memref<5x2x128xf32, #tpu.memory_space<vmem>>, vector<1x2x128xf32>
    %137 = vector.shape_cast %136 : vector<1x2x128xf32> to vector<2x128xf32>
    %138 = arith.mulf %55, %115 : vector<2x128xf32>
    %139 = arith.addf %137, %138 : vector<2x128xf32>
    %c2_76 = arith.constant 2 : index
    %c0_77 = arith.constant 0 : index
    %c0_78 = arith.constant 0 : index
    %140 = vector.load %arg12[%c2_76, %c0_77, %c0_78] : memref<5x2x128xf32, #tpu.memory_space<vmem>>, vector<1x2x128xf32>
    %141 = vector.shape_cast %140 : vector<1x2x128xf32> to vector<2x128xf32>
    %142 = vector.shape_cast %139 : vector<2x128xf32> to vector<1x2x128xf32>
    tpu.vector_store %arg12[%c2_76, %c0_77, %c0_78], %142 {strides = array<i32>} : memref<5x2x128xf32, #tpu.memory_space<vmem>>, vector<1x2x128xf32>,
    %143 = arith.extui %50 : vector<2x128xi1> to vector<2x128xi32>
    %144 = arith.sitofp %143 : vector<2x128xi32> to vector<2x128xf32>
    %145 = arith.mulf %28, %36 : vector<2x128xf32>
    %c3 = arith.constant 3 : index
    %c0_79 = arith.constant 0 : index
    %c0_80 = arith.constant 0 : index
    %146 = vector.load %arg9[%c3, %c0_79, %c0_80] : memref<5x2x128xf32, #tpu.memory_space<vmem>>, vector<1x2x128xf32>
    %147 = vector.shape_cast %146 : vector<1x2x128xf32> to vector<2x128xf32>
    %148 = arith.mulf %145, %144 : vector<2x128xf32>
    %149 = arith.addf %147, %148 : vector<2x128xf32>
    %c3_81 = arith.constant 3 : index
    %c0_82 = arith.constant 0 : index
    %c0_83 = arith.constant 0 : index
    %150 = vector.load %arg9[%c3_81, %c0_82, %c0_83] : memref<5x2x128xf32, #tpu.memory_space<vmem>>, vector<1x2x128xf32>
    %151 = vector.shape_cast %150 : vector<1x2x128xf32> to vector<2x128xf32>
    %152 = vector.shape_cast %149 : vector<2x128xf32> to vector<1x2x128xf32>
    tpu.vector_store %arg9[%c3_81, %c0_82, %c0_83], %152 {strides = array<i32>} : memref<5x2x128xf32, #tpu.memory_space<vmem>>, vector<1x2x128xf32>,
    %c3_84 = arith.constant 3 : index
    %c0_85 = arith.constant 0 : index
    %c0_86 = arith.constant 0 : index
    %153 = vector.load %arg10[%c3_84, %c0_85, %c0_86] : memref<5x2x128xf32, #tpu.memory_space<vmem>>, vector<1x2x128xf32>
    %154 = vector.shape_cast %153 : vector<1x2x128xf32> to vector<2x128xf32>
    %155 = arith.addf %154, %145 : vector<2x128xf32>
    %c3_87 = arith.constant 3 : index
    %c0_88 = arith.constant 0 : index
    %c0_89 = arith.constant 0 : index
    %156 = vector.load %arg10[%c3_87, %c0_88, %c0_89] : memref<5x2x128xf32, #tpu.memory_space<vmem>>, vector<1x2x128xf32>
    %157 = vector.shape_cast %156 : vector<1x2x128xf32> to vector<2x128xf32>
    %158 = vector.shape_cast %155 : vector<2x128xf32> to vector<1x2x128xf32>
    tpu.vector_store %arg10[%c3_87, %c0_88, %c0_89], %158 {strides = array<i32>} : memref<5x2x128xf32, #tpu.memory_space<vmem>>, vector<1x2x128xf32>,
    %c3_90 = arith.constant 3 : index
    %c0_91 = arith.constant 0 : index
    %c0_92 = arith.constant 0 : index
    %159 = vector.load %arg11[%c3_90, %c0_91, %c0_92] : memref<5x2x128xf32, #tpu.memory_space<vmem>>, vector<1x2x128xf32>
    %160 = vector.shape_cast %159 : vector<1x2x128xf32> to vector<2x128xf32>
    %161 = arith.addf %160, %144 : vector<2x128xf32>
    %c3_93 = arith.constant 3 : index
    %c0_94 = arith.constant 0 : index
    %c0_95 = arith.constant 0 : index
    %162 = vector.load %arg11[%c3_93, %c0_94, %c0_95] : memref<5x2x128xf32, #tpu.memory_space<vmem>>, vector<1x2x128xf32>
    %163 = vector.shape_cast %162 : vector<1x2x128xf32> to vector<2x128xf32>
    %164 = vector.shape_cast %161 : vector<2x128xf32> to vector<1x2x128xf32>
    tpu.vector_store %arg11[%c3_93, %c0_94, %c0_95], %164 {strides = array<i32>} : memref<5x2x128xf32, #tpu.memory_space<vmem>>, vector<1x2x128xf32>,
    %c3_96 = arith.constant 3 : index
    %c0_97 = arith.constant 0 : index
    %c0_98 = arith.constant 0 : index
    %165 = vector.load %arg12[%c3_96, %c0_97, %c0_98] : memref<5x2x128xf32, #tpu.memory_space<vmem>>, vector<1x2x128xf32>
    %166 = vector.shape_cast %165 : vector<1x2x128xf32> to vector<2x128xf32>
    %167 = arith.mulf %55, %144 : vector<2x128xf32>
    %168 = arith.addf %166, %167 : vector<2x128xf32>
    %c3_99 = arith.constant 3 : index
    %c0_100 = arith.constant 0 : index
    %c0_101 = arith.constant 0 : index
    %169 = vector.load %arg12[%c3_99, %c0_100, %c0_101] : memref<5x2x128xf32, #tpu.memory_space<vmem>>, vector<1x2x128xf32>
    %170 = vector.shape_cast %169 : vector<1x2x128xf32> to vector<2x128xf32>
    %171 = vector.shape_cast %168 : vector<2x128xf32> to vector<1x2x128xf32>
    tpu.vector_store %arg12[%c3_99, %c0_100, %c0_101], %171 {strides = array<i32>} : memref<5x2x128xf32, #tpu.memory_space<vmem>>, vector<1x2x128xf32>,
    %172 = arith.extui %53 : vector<2x128xi1> to vector<2x128xi32>
    %173 = arith.sitofp %172 : vector<2x128xi32> to vector<2x128xf32>
    %174 = arith.mulf %30, %36 : vector<2x128xf32>
    %c4 = arith.constant 4 : index
    %c0_102 = arith.constant 0 : index
    %c0_103 = arith.constant 0 : index
    %175 = vector.load %arg9[%c4, %c0_102, %c0_103] : memref<5x2x128xf32, #tpu.memory_space<vmem>>, vector<1x2x128xf32>
    %176 = vector.shape_cast %175 : vector<1x2x128xf32> to vector<2x128xf32>
    %177 = arith.mulf %174, %173 : vector<2x128xf32>
    %178 = arith.addf %176, %177 : vector<2x128xf32>
    %c4_104 = arith.constant 4 : index
    %c0_105 = arith.constant 0 : index
    %c0_106 = arith.constant 0 : index
    %179 = vector.load %arg9[%c4_104, %c0_105, %c0_106] : memref<5x2x128xf32, #tpu.memory_space<vmem>>, vector<1x2x128xf32>
    %180 = vector.shape_cast %179 : vector<1x2x128xf32> to vector<2x128xf32>
    %181 = vector.shape_cast %178 : vector<2x128xf32> to vector<1x2x128xf32>
    tpu.vector_store %arg9[%c4_104, %c0_105, %c0_106], %181 {strides = array<i32>} : memref<5x2x128xf32, #tpu.memory_space<vmem>>, vector<1x2x128xf32>,
    %c4_107 = arith.constant 4 : index
    %c0_108 = arith.constant 0 : index
    %c0_109 = arith.constant 0 : index
    %182 = vector.load %arg10[%c4_107, %c0_108, %c0_109] : memref<5x2x128xf32, #tpu.memory_space<vmem>>, vector<1x2x128xf32>
    %183 = vector.shape_cast %182 : vector<1x2x128xf32> to vector<2x128xf32>
    %184 = arith.addf %183, %174 : vector<2x128xf32>
    %c4_110 = arith.constant 4 : index
    %c0_111 = arith.constant 0 : index
    %c0_112 = arith.constant 0 : index
    %185 = vector.load %arg10[%c4_110, %c0_111, %c0_112] : memref<5x2x128xf32, #tpu.memory_space<vmem>>, vector<1x2x128xf32>
    %186 = vector.shape_cast %185 : vector<1x2x128xf32> to vector<2x128xf32>
    %187 = vector.shape_cast %184 : vector<2x128xf32> to vector<1x2x128xf32>
    tpu.vector_store %arg10[%c4_110, %c0_111, %c0_112], %187 {strides = array<i32>} : memref<5x2x128xf32, #tpu.memory_space<vmem>>, vector<1x2x128xf32>,
    %c4_113 = arith.constant 4 : index
    %c0_114 = arith.constant 0 : index
    %c0_115 = arith.constant 0 : index
    %188 = vector.load %arg11[%c4_113, %c0_114, %c0_115] : memref<5x2x128xf32, #tpu.memory_space<vmem>>, vector<1x2x128xf32>
    %189 = vector.shape_cast %188 : vector<1x2x128xf32> to vector<2x128xf32>
    %190 = arith.addf %189, %173 : vector<2x128xf32>
    %c4_116 = arith.constant 4 : index
    %c0_117 = arith.constant 0 : index
    %c0_118 = arith.constant 0 : index
    %191 = vector.load %arg11[%c4_116, %c0_117, %c0_118] : memref<5x2x128xf32, #tpu.memory_space<vmem>>, vector<1x2x128xf32>
    %192 = vector.shape_cast %191 : vector<1x2x128xf32> to vector<2x128xf32>
    %193 = vector.shape_cast %190 : vector<2x128xf32> to vector<1x2x128xf32>
    tpu.vector_store %arg11[%c4_116, %c0_117, %c0_118], %193 {strides = array<i32>} : memref<5x2x128xf32, #tpu.memory_space<vmem>>, vector<1x2x128xf32>,
    %c4_119 = arith.constant 4 : index
    %c0_120 = arith.constant 0 : index
    %c0_121 = arith.constant 0 : index
    %194 = vector.load %arg12[%c4_119, %c0_120, %c0_121] : memref<5x2x128xf32, #tpu.memory_space<vmem>>, vector<1x2x128xf32>
    %195 = vector.shape_cast %194 : vector<1x2x128xf32> to vector<2x128xf32>
    %196 = arith.mulf %55, %173 : vector<2x128xf32>
    %197 = arith.addf %195, %196 : vector<2x128xf32>
    %c4_122 = arith.constant 4 : index
    %c0_123 = arith.constant 0 : index
    %c0_124 = arith.constant 0 : index
    %198 = vector.load %arg12[%c4_122, %c0_123, %c0_124] : memref<5x2x128xf32, #tpu.memory_space<vmem>>, vector<1x2x128xf32>
    %199 = vector.shape_cast %198 : vector<1x2x128xf32> to vector<2x128xf32>
    %200 = vector.shape_cast %197 : vector<2x128xf32> to vector<1x2x128xf32>
    tpu.vector_store %arg12[%c4_122, %c0_123, %c0_124], %200 {strides = array<i32>} : memref<5x2x128xf32, #tpu.memory_space<vmem>>, vector<1x2x128xf32>,
    %c0_i32_125 = arith.constant 0 : i32
    %201 = arith.cmpi eq, %arg2, %c0_i32_125 : i32
    %202 = arith.extui %201 : i1 to i32
    %c0_i32_126 = arith.constant 0 : i32
    %203 = arith.cmpi ne, %202, %c0_i32_126 : i32
    scf.if %203 {
      %c0_127 = arith.constant 0 : index
      %c0_128 = arith.constant 0 : index
      %c0_129 = arith.constant 0 : index
      %204 = vector.load %arg9[%c0_127, %c0_128, %c0_129] : memref<5x2x128xf32, #tpu.memory_space<vmem>>, vector<5x2x128xf32>
      %cst_130 = arith.constant dense<0.000000e+00> : vector<5x2xf32>
      %205 = vector.multi_reduction <add>, %204, %cst_130 [2] : vector<5x2x128xf32> to vector<5x2xf32>
      %cst_131 = arith.constant dense<0.000000e+00> : vector<5xf32>
      %206 = vector.multi_reduction <add>, %205, %cst_131 [1] : vector<5x2xf32> to vector<5xf32>
      %207 = vector.shape_cast %206 : vector<5xf32> to vector<5x1xf32>
      %c0_132 = arith.constant 0 : index
      %c0_133 = arith.constant 0 : index
      %c0_134 = arith.constant 0 : index
      %c0_135 = arith.constant 0 : index
      %208 = vector.load %arg5[%c0_132, %c0_133, %c0_134, %c0_135] : memref<1x1x5x1xf32, #tpu.memory_space<vmem>>, vector<1x1x5x1xf32>
      %209 = vector.shape_cast %208 : vector<1x1x5x1xf32> to vector<5x1xf32>
      %210 = vector.shape_cast %207 : vector<5x1xf32> to vector<1x1x5x1xf32>
      tpu.vector_store %arg5[%c0_132, %c0_133, %c0_134, %c0_135], %210 {strides = array<i32>} : memref<1x1x5x1xf32, #tpu.memory_space<vmem>>, vector<1x1x5x1xf32>,
      %c0_136 = arith.constant 0 : index
      %c0_137 = arith.constant 0 : index
      %c0_138 = arith.constant 0 : index
      %211 = vector.load %arg10[%c0_136, %c0_137, %c0_138] : memref<5x2x128xf32, #tpu.memory_space<vmem>>, vector<5x2x128xf32>
      %cst_139 = arith.constant dense<0.000000e+00> : vector<5x2xf32>
      %212 = vector.multi_reduction <add>, %211, %cst_139 [2] : vector<5x2x128xf32> to vector<5x2xf32>
      %cst_140 = arith.constant dense<0.000000e+00> : vector<5xf32>
      %213 = vector.multi_reduction <add>, %212, %cst_140 [1] : vector<5x2xf32> to vector<5xf32>
      %214 = vector.shape_cast %213 : vector<5xf32> to vector<5x1xf32>
      %c0_141 = arith.constant 0 : index
      %c0_142 = arith.constant 0 : index
      %c0_143 = arith.constant 0 : index
      %c0_144 = arith.constant 0 : index
      %215 = vector.load %arg6[%c0_141, %c0_142, %c0_143, %c0_144] : memref<1x1x5x1xf32, #tpu.memory_space<vmem>>, vector<1x1x5x1xf32>
      %216 = vector.shape_cast %215 : vector<1x1x5x1xf32> to vector<5x1xf32>
      %217 = vector.shape_cast %214 : vector<5x1xf32> to vector<1x1x5x1xf32>
      tpu.vector_store %arg6[%c0_141, %c0_142, %c0_143, %c0_144], %217 {strides = array<i32>} : memref<1x1x5x1xf32, #tpu.memory_space<vmem>>, vector<1x1x5x1xf32>,
      %c0_145 = arith.constant 0 : index
      %c0_146 = arith.constant 0 : index
      %c0_147 = arith.constant 0 : index
      %218 = vector.load %arg11[%c0_145, %c0_146, %c0_147] : memref<5x2x128xf32, #tpu.memory_space<vmem>>, vector<5x2x128xf32>
      %cst_148 = arith.constant dense<0.000000e+00> : vector<5x2xf32>
      %219 = vector.multi_reduction <add>, %218, %cst_148 [2] : vector<5x2x128xf32> to vector<5x2xf32>
      %cst_149 = arith.constant dense<0.000000e+00> : vector<5xf32>
      %220 = vector.multi_reduction <add>, %219, %cst_149 [1] : vector<5x2xf32> to vector<5xf32>
      %221 = vector.shape_cast %220 : vector<5xf32> to vector<5x1xf32>
      %c0_150 = arith.constant 0 : index
      %c0_151 = arith.constant 0 : index
      %c0_152 = arith.constant 0 : index
      %c0_153 = arith.constant 0 : index
      %222 = vector.load %arg7[%c0_150, %c0_151, %c0_152, %c0_153] : memref<1x1x5x1xf32, #tpu.memory_space<vmem>>, vector<1x1x5x1xf32>
      %223 = vector.shape_cast %222 : vector<1x1x5x1xf32> to vector<5x1xf32>
      %224 = vector.shape_cast %221 : vector<5x1xf32> to vector<1x1x5x1xf32>
      tpu.vector_store %arg7[%c0_150, %c0_151, %c0_152, %c0_153], %224 {strides = array<i32>} : memref<1x1x5x1xf32, #tpu.memory_space<vmem>>, vector<1x1x5x1xf32>,
      %c0_154 = arith.constant 0 : index
      %c0_155 = arith.constant 0 : index
      %c0_156 = arith.constant 0 : index
      %225 = vector.load %arg12[%c0_154, %c0_155, %c0_156] : memref<5x2x128xf32, #tpu.memory_space<vmem>>, vector<5x2x128xf32>
      %cst_157 = arith.constant dense<0.000000e+00> : vector<5x2xf32>
      %226 = vector.multi_reduction <add>, %225, %cst_157 [2] : vector<5x2x128xf32> to vector<5x2xf32>
      %cst_158 = arith.constant dense<0.000000e+00> : vector<5xf32>
      %227 = vector.multi_reduction <add>, %226, %cst_158 [1] : vector<5x2xf32> to vector<5xf32>
      %228 = vector.shape_cast %227 : vector<5xf32> to vector<5x1xf32>
      %c0_159 = arith.constant 0 : index
      %c0_160 = arith.constant 0 : index
      %c0_161 = arith.constant 0 : index
      %c0_162 = arith.constant 0 : index
      %229 = vector.load %arg8[%c0_159, %c0_160, %c0_161, %c0_162] : memref<1x1x5x1xf32, #tpu.memory_space<vmem>>, vector<1x1x5x1xf32>
      %230 = vector.shape_cast %229 : vector<1x1x5x1xf32> to vector<5x1xf32>
      %231 = vector.shape_cast %228 : vector<5x1xf32> to vector<1x1x5x1xf32>
      tpu.vector_store %arg8[%c0_159, %c0_160, %c0_161, %c0_162], %231 {strides = array<i32>} : memref<1x1x5x1xf32, #tpu.memory_space<vmem>>, vector<1x1x5x1xf32>,
    } else {
    }
    return
  }
  func.func @transform_0(%arg0: i32, %arg1: i32, %arg2: i32) -> (i32, i32, i32, i32) {
    %c1_i32 = arith.constant 1 : i32
    %0 = arith.muli %arg1, %c1_i32 : i32
    %1 = arith.addi %0, %arg2 : i32
    %c0_i32 = arith.constant 0 : i32
    %2 = arith.minsi %1, %c0_i32 : i32
    %c0_i32_0 = arith.constant 0 : i32
    %c0_i32_1 = arith.constant 0 : i32
    %c0_i32_2 = arith.constant 0 : i32
    return %arg0, %c0_i32_0, %2, %c0_i32_1 : i32, i32, i32, i32
  }
  func.func @transform_1(%arg0: i32, %arg1: i32, %arg2: i32) -> (i32, i32, i32) {
    %c1_i32 = arith.constant 1 : i32
    %0 = arith.muli %arg1, %c1_i32 : i32
    %1 = arith.addi %0, %arg2 : i32
    %c0_i32 = arith.constant 0 : i32
    %2 = arith.minsi %1, %c0_i32 : i32
    %c0_i32_0 = arith.constant 0 : i32
    %c0_i32_1 = arith.constant 0 : i32
    return %arg0, %2, %c0_i32_0 : i32, i32, i32
  }
  func.func @transform_2(%arg0: i32, %arg1: i32, %arg2: i32) -> (i32, i32, i32, i32) {
    %c0_i32 = arith.constant 0 : i32
    %c0_i32_0 = arith.constant 0 : i32
    %c0_i32_1 = arith.constant 0 : i32
    return %arg0, %arg1, %c0_i32, %c0_i32_0 : i32, i32, i32, i32
  }
  func.func @transform_3(%arg0: i32, %arg1: i32, %arg2: i32) -> (i32, i32, i32, i32) {
    %c0_i32 = arith.constant 0 : i32
    %c0_i32_0 = arith.constant 0 : i32
    %c0_i32_1 = arith.constant 0 : i32
    return %arg0, %arg1, %c0_i32, %c0_i32_0 : i32, i32, i32, i32
  }
  func.func @transform_4(%arg0: i32, %arg1: i32, %arg2: i32) -> (i32, i32, i32, i32) {
    %c0_i32 = arith.constant 0 : i32
    %c0_i32_0 = arith.constant 0 : i32
    %c0_i32_1 = arith.constant 0 : i32
    return %arg0, %arg1, %c0_i32, %c0_i32_0 : i32, i32, i32, i32
  }
  func.func @transform_5(%arg0: i32, %arg1: i32, %arg2: i32) -> (i32, i32, i32, i32) {
    %c0_i32 = arith.constant 0 : i32
    %c0_i32_0 = arith.constant 0 : i32
    %c0_i32_1 = arith.constant 0 : i32
    return %arg0, %arg1, %c0_i32, %c0_i32_0 : i32, i32, i32, i32
  }
}

</mosaic_0001>

<bundles_post_ra>
// kernel: tpu_custom_call.1
= control target key start
LH: loop header
LB: loop body
LE: loop exit
PB: predicated region body
PF: predicated region fallthrough
CT: control target
= control target key end

     0   :  { %11 = vsyncpa [#allocation7], 0  ;;  %s1570_s0 = inlined_call_operand.hbm [shape: f32[2,5,2,128], index: 0, kind: input, shape index: {}]   ;;  %s1571_s1 = inlined_call_operand.hbm [shape: s32[2,2,128], index: 1, kind: input, shape index: {}]   ;;  %s1572_s2 = inlined_call_operand.vmem [shape: f32[2,1,5,1], index: 2, kind: output, shape index: {0}]   ;;  %s1573_s3 = inlined_call_operand.vmem [shape: f32[2,1,5,1], index: 3, kind: output, shape index: {1}]   ;;  %s1574_s4 = inlined_call_operand.vmem [shape: f32[2,1,5,1], index: 4, kind: output, shape index: {2}]   ;;  %s1575_s5 = inlined_call_operand.vmem [shape: f32[2,1,5,1], index: 5, kind: output, shape index: {3}]  }
   0x1   :  { %13 = vsyncpa [#allocation7 + $0x1], 0 }
   0x2   :  { %14 = vsyncpa [#allocation9], 0 }
   0x3   :  { %16 = vsyncpa [#allocation9 + $0x1], 0  ;;  %s1276_s18 = smov 0   ;;  %s1278_s19 = smov 0  }
   0x4   :  { %s1280_s20 = smov 0   ;;  %s1282_s21 = smov 0  }
   0x5   :  { %s1284_s22 = smov 0   ;;  %s1286_s23 = smov 0  }
   0x6 LB: > { %s1025_s24 = sadd.s32 4294967295, %s1239_s23   ;;  %s41_s25 = sadd.s32 1, %s1235_s22  ;;  %s1239_s23 = sphi %s1286_s23, %s22_s23   ;;  %s1235_s22 = sphi %s1284_s22, %s1586_s22   ;;  %s1231_s21 = sphi %s1282_s21, %s1585_s21   ;;  %s1227_s20 = sphi %s1280_s20, %s1584_s20   ;;  %s1223_s19 = sphi %s1278_s19, %s1583_s19   ;;  %s1219_s18 = sphi %s1276_s18, %s1582_s18  }
   0x7   : > { %p43_p0 = scmp.ge.s32.totalorder %s41_s25, 2  ;;  %s56_s26 = sadd.s32 1, %s1227_s20 }
   0x8   : > { %p63_p1 = scmp.ne.s32.totalorder %s1227_s20, %s1223_s19  ;;  %p64_p2 = scmp.eq.s32.totalorder %s1239_s23, 0 }
   0x9   : > { %s1588_s25 = smov (%p43_p0, %s41_s25), 0  ;;  %p69_p4 = scmp.ne.s32.totalorder %s1223_s19, %s1219_s18 }
   0xa   : > { %p65_p3 = por %p64_p2, %p63_p1  ;;  %s51_s27 = ssub.s32 %s1235_s22, %s1588_s25 }
   0xb   : > { %p70_p5 = scmp.eq.s32.totalorder %s1025_s24, 0  ;;  %p54_p6 = scmp.eq.s32.totalorder %s51_s27, 0 }
   0xc   : > { %p1059_p8 = scmp.lt.s32.totalorder %s1239_s23, 2  ;;  %s1324_s30 = sand.u32 1, %s1227_s20  }
   0xd   : > { %p1315_p7 = por %p70_p5, %p69_p4  ;;  %s1046_s6 = smul.u32 160, %s1235_s22 }
   0xe   : > { %s1321_s29 = scalar_select %p54_p6, %s1227_s20, %s56_s26  }
   0xf   : > { %s1577_s28 = scalar_select %p1315_p7, 1, 0 }
  0x10   : > { %s1045_s7 = smul.u32 10, %s1324_s30  ;;  %s1331_s10 = scalar_lea.hbm %s1570_s0, %s1046_s6 }
  0x11   : > { %p1333_p9 = pnand %p1059_p8, %p65_p3  ;;  %s240_s14 = scalar_lea.sflag [#allocation7], %s1324_s30 }
  0x12   : > { %s243_s12 = scalar_lea.vmem [#allocation6], %s1045_s7  ;;  %s1125_s15 = scalar_lea.hbm %s1331_s10, 160 }
  0x13   : > { %s254_s13 = sshll.u32 %s243_s12, 4  ;;  %p1126_p10 = scmp.ne.s32.totalorder %s1331_s10, %s1125_s15  ;;  %s1337_s13 = int_to_ptr.vmem [resolvable:$true] %s254_s13 }
  0x14   : > { %p1127_p11 = pneg %p1333_p9  ;;  %s1130_s18 = scalar_lea.hbm %s1570_s0, 320 }
  0x15   : > { %p1131_p0 = scmp.lt.u32.totalorder %s1331_s10, %s1570_s0  ;;  %p1132_p1 = scmp.lt.u32.totalorder %s1130_s18, %s1125_s15 }
  0x16   : > { %p1128_p12 = pnand %p1127_p11, %p1126_p10  ;;  %p1134_p3 = scmp.lt.u32.totalorder %s1125_s15, %s1331_s10 }
  0x17   : > { %p1133_p2 = por %p1132_p1, %p1131_p0 }
  0x18   : > { %p1129_p13 = pneg %p1128_p12 }
  0x19   : > { %p1135_p4 = por %p1134_p3, %p1133_p2 }
  0x1b   : > { %p1136_p5 = pnand %p1135_p4, %p1129_p13 }
  0x1d   : > { %1139 = shalt.err (!%p1136_p5)
}
  0x1e   : > { %s1140_s27 = scalar_lea.vmem %s1337_s13, 160  ;;  %s1241_s6 = smov [#allocation6]  }
  0x1f   : > { %p1141_p6 = scmp.ne.s32.totalorder %s1337_s13, %s1140_s27  ;;  %s1145_s7 = sshll.u32 %s1241_s6, 4  ;;  %s1146_s7 = int_to_ptr.vmem [resolvable:$false] %s1145_s7 }
  0x20   : > { %s1147_s8 = scalar_lea.vmem %s1146_s7, 320  ;;  %p1148_p12 = scmp.lt.s32.totalorder %s1337_s13, %s1146_s7 }
  0x21   : > { %p1143_p8 = pnand %p1141_p6, %p1127_p11  ;;  %p1149_p0 = scmp.lt.s32.totalorder %s1147_s8, %s1140_s27 }
  0x23   : > { %p1144_p10 = pneg %p1143_p8  ;;  %p1150_p1 = por %p1149_p0, %p1148_p12 }
  0x25   : > { %p1151_p2 = pnand %p1150_p1, %p1144_p10 }
  0x27   : > { %1154 = shalt.err (!%p1151_p2)
}
  0x28   : > { %s1242_s9 = smov 32   ;;  %s1243_s12 = smov 2  }
  0x29   : > { %1055 = dma.hbm_to_vmem [thread:$0]  (!%p1333_p9), %s1331_s10, 160, %s1337_s13, %s240_s14, %s1242_s9, %s1242_s9, %s1243_s12  }
  0x2a   : > { %p1032_p13 = scmp.ge.s32.totalorder %s1239_s23, 1  ;;  %p284_p3 = scmp.lt.s32.totalorder %s1239_s23, 3 }
  0x2b   : > { %s1030_s15 = sshll.u32 %s1324_s30, 1  ;;  %s1031_s17 = sshll.u32 %s1235_s22, 5 }
  0x2c   : > { %p1370_p4 = pnand %p1032_p13, %p284_p3  ;;  %s268_s18 = scalar_lea.vmem [#allocation8], %s1030_s15 }
  0x2d   : > { %s279_s24 = sshll.u32 %s268_s18, 4  ;;  %s1378_s6 = scalar_lea.hbm %s1571_s1, %s1031_s17  ;;  %s280_s24 = int_to_ptr.vmem [resolvable:$true] %s279_s24 }
  0x2e   : > { %s1579_s16 = scalar_select %p1370_p4, 1, 0 }
  0x2f   : > { %s265_s10 = scalar_lea.sflag [#allocation9], %s1324_s30  ;;  %s1155_s13 = scalar_lea.hbm %s1378_s6, 32 }
  0x30   : > { %p1156_p5 = scmp.ne.s32.totalorder %s1378_s6, %s1155_s13  ;;  %s1160_s8 = scalar_lea.hbm %s1571_s1, 64 }
  0x31   : > { %p1161_p10 = scmp.lt.u32.totalorder %s1378_s6, %s1571_s1  ;;  %p1162_p12 = scmp.lt.u32.totalorder %s1160_s8, %s1155_s13 }
  0x32   : > { %p1158_p6 = pnand %p1156_p5, %p1127_p11  ;;  %p1164_p1 = scmp.lt.u32.totalorder %s1155_s13, %s1378_s6 }
  0x33   : > { %p1163_p0 = por %p1162_p12, %p1161_p10 }
  0x34   : > { %p1159_p8 = pneg %p1158_p6 }
  0x35   : > { %p1165_p2 = por %p1164_p1, %p1163_p0 }
  0x37   : > { %p1166_p13 = pnand %p1165_p2, %p1159_p8 }
  0x39   : > { %1169 = shalt.err (!%p1166_p13)
}
  0x3a   : > { %s1170_s30 = scalar_lea.vmem %s280_s24, 32  ;;  %s1244_s15 = smov [#allocation8]  }
  0x3b   : > { %p1171_p3 = scmp.ne.s32.totalorder %s280_s24, %s1170_s30  ;;  %s1175_s17 = sshll.u32 %s1244_s15, 4  ;;  %s1176_s17 = int_to_ptr.vmem [resolvable:$false] %s1175_s17 }
  0x3c   : > { %s1177_s18 = scalar_lea.vmem %s1176_s17, 64  ;;  %p1178_p7 = scmp.lt.s32.totalorder %s280_s24, %s1176_s17 }
  0x3d   : > { %p1173_p5 = pnand %p1171_p3, %p1127_p11  ;;  %p1179_p4 = scmp.lt.s32.totalorder %s1177_s18, %s1170_s30 }
  0x3f   : > { %p1174_p6 = pneg %p1173_p5  ;;  %p1180_p10 = por %p1179_p4, %p1178_p7 }
  0x41   : > { %p1181_p12 = pnand %p1180_p10, %p1174_p6 }
  0x43   : > { %1184 = shalt.err (!%p1181_p12)
}
  0x44   : > { %1058 = dma.hbm_to_vmem [thread:$0]  (!%p1333_p9), %s1378_s6, 32, %s280_s24, %s265_s10  }
  0x45   : > { %p1580_p8 = scmp.ne.s32.totalorder %s1579_s16, 0 }
  0x46   : > { %s290_s26 = sand.u32 (!%p1580_p8), 1, %s1223_s19   ;;  %p1581_p11 = scmp.ne.s32.totalorder (!%p1580_p8), %s1577_s28, 0 }
  0x47   : > { %288 = sbr.rel (%p1580_p8) target bundleno = 464 (0x1d0), region = 28  ;;  %s291_s13 = scalar_lea.sflag (!%p1580_p8), [#allocation7], %s290_s26 }
  0x48   : > { %s1047_s27 = smul.u32 (!%p1580_p8), 10, %s290_s26 }
  0x4a   : > { %s1403_s14 = scalar_lea.vmem (!%p1580_p8), [#allocation6], %s1047_s27 }
  0x4e   : > { %1210 = dma.done.wait (%p1581_p11), %s291_s13, 160  }
  0x4f   : > { %1212 = vsyncadd (%p1581_p11), %s291_s13, 4294967136  ;;  %s1033_s7 = sshll.u32 %s290_s26, 1  ;;  %s300_s11 = scalar_lea.sflag [#allocation9], %s290_s26 }
  0x50   : > { %s303_s8 = scalar_lea.vmem [#allocation8], %s1033_s7 }
  0x51   : > { %1214 = dma.done.wait (%p1581_p11), %s300_s11, 32  }
  0x52   : > { %1216 = vsyncadd (%p1581_p11), %s300_s11, 4294967264  ;;  %v1245_v0 = vmov 0.0   ;;  %v1414_v1 = vld [vmem:[%s1403_s14] sm:$0x3]  ;;  %v1416_v2 = vld [vmem:[%s303_s8] sm:$0x3] }
  0x53   : > { %406 = vst [vmem:[#allocation4] sm:$0x3] %v1245_v0  ;;  %396 = vst [vmem:[#allocation2] sm:$0x3] %v1245_v0  ;;  %v1419_v3 = vld [vmem:[%s1403_s14 + $0x2] sm:$0x3] }
  0x54   : > { %397 = vst [vmem:[#allocation2 + $0x2] sm:$0x3] %v1245_v0  ;;  %398 = vst [vmem:[#allocation2 + $0x4] sm:$0x3] %v1245_v0  ;;  %vm450_vm0 = vcmp.eq.s32.totalorder %v1416_v2, 0  ;;  %vm454_vm1 = vcmp.eq.s32.totalorder %v1416_v2, 2  ;;  %v422_v6 = vmax.f32 %v1414_v1, %v1419_v3 }
  0x55   : > { %399 = vst [vmem:[#allocation2 + $0x6] sm:$0x3] %v1245_v0  ;;  %400 = vst [vmem:[#allocation2 + $0x8] sm:$0x3] %v1245_v0  ;;  %v1427_v7 = vsel %vm450_vm0, 1.0, %v1245_v0  ;;  %v1431_v8 = vsel %vm454_vm1, 1.0, %v1245_v0 }
  0x56   : > { %401 = vst [vmem:[#allocation3] sm:$0x3] %v1245_v0  ;;  %402 = vst [vmem:[#allocation3 + $0x2] sm:$0x3] %v1245_v0  ;;  %v1434_v9 = vld [vmem:[%s1403_s14 + $0x4] sm:$0x3] }
  0x57   : > { %403 = vst [vmem:[#allocation3 + $0x4] sm:$0x3] %v1245_v0  ;;  %404 = vst [vmem:[#allocation3 + $0x6] sm:$0x3] %v1245_v0  ;;  %vm452_vm2 = vcmp.eq.s32.totalorder %v1416_v2, 1  ;;  %v423_v12 = vmax.f32 %v422_v6, %v1434_v9  ;;  %vm456_vm3 = vcmp.eq.s32.totalorder %v1416_v2, 3 }
  0x58   : > { %405 = vst [vmem:[#allocation3 + $0x8] sm:$0x3] %v1245_v0  ;;  %407 = vst [vmem:[#allocation4 + $0x2] sm:$0x3] %v1245_v0  ;;  %v419_v14 = vld [vmem:[%s1403_s14 + $0x6] sm:$0x3] }
  0x59   : > { %408 = vst [vmem:[#allocation4 + $0x4] sm:$0x3] %v1245_v0  ;;  %409 = vst [vmem:[#allocation4 + $0x6] sm:$0x3] %v1245_v0  ;;  %v1443_v15 = vsel %vm452_vm2, 1.0, %v1245_v0  ;;  %v424_v19 = vmax.f32 %v423_v12, %v419_v14  ;;  %v1452_v20 = vsel %vm456_vm3, 1.0, %v1245_v0 }
  0x5a   : > { %410 = vst [vmem:[#allocation4 + $0x8] sm:$0x3] %v1245_v0  ;;  %411 = vst [vmem:[#allocation5] sm:$0x3] %v1245_v0  ;;  %v471_v4 = vld [vmem:[#allocation4] sm:$0x3] }
  0x5b   : > { %412 = vst [vmem:[#allocation5 + $0x2] sm:$0x3] %v1245_v0  ;;  %413 = vst [vmem:[#allocation5 + $0x4] sm:$0x3] %v1245_v0  ;;  %v472_v10 = vadd.f32 %v1427_v7, %v471_v4  ;;  %v1446_v16 = vld [vmem:[%s1403_s14 + $0x8] sm:$0x3] }
  0x5c   : > { %414 = vst [vmem:[#allocation5 + $0x6] sm:$0x3] %v1245_v0  ;;  %415 = vst [vmem:[#allocation5 + $0x8] sm:$0x3] %v1245_v0  ;;  %v1456_v22 = vmax.f32 %v424_v19, %v1446_v16  ;;  %vm458_vm4 = vcmp.eq.s32.totalorder %v1416_v2, 4  ;;  %vm570_vm5 = vcmask 1041408  }
  0x5d   : > { %473 = vst [vmem:[#allocation4] sm:$0x3] %v472_v10  ;;  %v1467_v27 = vsel %vm458_vm4, 1.0, %v1245_v0  ;;  %v451_v53 = vsel %vm450_vm0, %v1414_v1, 0.0  ;;  %v468_v58 = vld [vmem:[#allocation3] sm:$0x3] }
  0x5e   : > { %v429_v23 = vsub.f32 %v1419_v3, %v1456_v22  ;;  %v432_v24 = vsub.f32 %v1434_v9, %v1456_v22  ;;  %v426_v26 = vsub.f32 %v1414_v1, %v1456_v22  ;;  %v435_v29 = vsub.f32 %v419_v14, %v1456_v22  ;;  %v487_v59 = vld [vmem:[#allocation3 + $0x2] sm:$0x3]  ;;  %v464_v62 = vld [vmem:[#allocation2] sm:$0x3]  ;;  %v508_v1 = vld [vmem:[#allocation3 + $0x4] sm:$0x3] }
  0x5f   : > { %v491_v13 = vld [vmem:[#allocation4 + $0x2] sm:$0x3]  ;;  %v438_v35 = vsub.f32 %v1446_v16, %v1456_v22  ;;  %v453_v54 = vsel %vm452_vm2, %v1419_v3, %v451_v53  ;;  %v482_v6 = vld [vmem:[#allocation2 + $0x2] sm:$0x3]  ;;  %v550_v10 = vld [vmem:[#allocation3 + $0x8] sm:$0x3] }
  0x60   : > { %v512_v5 = vld [vmem:[#allocation4 + $0x4] sm:$0x3]  ;;  %v533_v17 = vld [vmem:[#allocation4 + $0x6] sm:$0x3]  ;;  %v492_v18 = vadd.f32 %v1443_v15, %v491_v13  ;;  %v430_v28 = vmul.f32 1.442695, %v429_v23  ;;  %v455_v55 = vsel %vm454_vm1, %v1434_v9, %v453_v54 }
  0x61   : > { %v513_v11 = vadd.f32 %v1431_v8, %v512_v5  ;;  %v534_v21 = vadd.f32 %v1452_v20, %v533_v17  ;;  %v554_v25 = vld [vmem:[#allocation4 + $0x8] sm:$0x3]  ;;  %v433_v33 = vmul.f32 1.442695, %v432_v24  ;;  %v427_v36 = vmul.f32 1.442695, %v426_v26 }
  0x62   : > { %493 = vst [vmem:[#allocation4 + $0x2] sm:$0x3] %v492_v18  ;;  %v555_v30 = vadd.f32 %v1467_v27, %v554_v25  ;;  %1111 = vpow2.f32 %v430_v28  ;;  %v436_v40 = vmul.f32 1.442695, %v435_v29  ;;  %v439_v42 = vmul.f32 1.442695, %v438_v35 }
  0x63   : > { %514 = vst [vmem:[#allocation4 + $0x4] sm:$0x3] %v513_v11  ;;  %535 = vst [vmem:[#allocation4 + $0x6] sm:$0x3] %v534_v21  ;;  %1113 = vpow2.f32 %v433_v33  ;;  %v457_v56 = vsel %vm456_vm3, %v419_v14, %v455_v55  ;;  %v529_v5 = vld [vmem:[#allocation3 + $0x6] sm:$0x3] }
  0x64   : > { %v682_v31 = vld [vmem:[#allocation4] sm:$0x3]  ;;  %556 = vst [vmem:[#allocation4 + $0x8] sm:$0x3] %v555_v30  ;;  %1115 = vpow2.f32 %v427_v36  ;;  %v459_v9 = vsel %vm458_vm4, %v1446_v16, %v457_v56  ;;  %v503_v18 = vld [vmem:[#allocation2 + $0x4] sm:$0x3] }
  0x65   : > { %v687_v34 = vsel %vm570_vm5, %v682_v31, 0.0  ;;  %1117 = vpow2.f32 %v436_v40  ;;  %v524_v19 = vld [vmem:[#allocation2 + $0x6] sm:$0x3]  ;;  %v545_v29 = vld [vmem:[#allocation2 + $0x8] sm:$0x3]  ;;  %vm613_vm6 = vcmask 1041409  }
  0x66   : > { %688 = vadd.xlane.f32.xlu0 %v687_v34  ;;  %1119 = vpow2.f32 %v439_v42  ;;  %v495_v34 = vld [vmem:[#allocation5 + $0x2] sm:$0x3]  ;;  %v474_v36 = vld [vmem:[#allocation5] sm:$0x3]  ;;  %v558_v42 = vld [vmem:[#allocation5 + $0x8] sm:$0x3] }
  0x67   : > { %vm615_vm7 = vcmask 1042434   ;;  %vm619_vm8 = vcmask 1044484   ;;  %vm617_vm9 = vcmask 1043459   ;;  %vm622_vm10 = vcmask 12288   ;;  %p364_p7 = scmp.lt.s32.totalorder %s1231_s21, 1 }
  0x68   : > { %vm626_vm11 = vcmask 4096  }
  0x69   : > { %v683_v37 = vld [vmem:[#allocation4 + $0x2] sm:$0x3]  ;;  %s1590_s21 = smov (!%p364_p7, %s1231_s21), 1 }
  0x6a   : > { %v684_v32 = vld [vmem:[#allocation4 + $0x4] sm:$0x3]  ;;  %v690_v39 = vsel %vm570_vm5, %v683_v37, 0.0  ;;  %v685_v41 = vld [vmem:[#allocation4 + $0x6] sm:$0x3]  ;;  %s1034_s28 = sshll.u32 %s1590_s21, 3 }
  0x6b   : > { %v693_v38 = vsel %vm570_vm5, %v684_v32, 0.0  ;;  %691 = vadd.xlane.f32.xlu1 %v690_v39  ;;  %v696_v43 = vsel %vm570_vm5, %v685_v41, 0.0  ;;  %v516_v37 = vld [vmem:[#allocation5 + $0x4] sm:$0x3]  ;;  %s377_s6 = scalar_lea.vmem %s1573_s3, %s1034_s28  ;;  %s370_s12 = scalar_lea.vmem %s1572_s2, %s1034_s28 }
  0x6c   : > { %694 = vadd.xlane.f32.xlu0 %v693_v38  ;;  %v1112_v44 = vpop.eup %1111  ;;  %v537_v38 = vld [vmem:[#allocation5 + $0x6] sm:$0x3]  ;;  %s384_s17 = scalar_lea.vmem %s1574_s4, %s1034_s28  ;;  %s391_s26 = scalar_lea.vmem %s1575_s5, %s1034_s28 }
  0x6d   : > { %v1114_v45 = vpop.eup %1113 }
  0x6e   : > { %v1116_v46 = vpop.eup %1115 }
  0x6f   : > { %v441_v47 = vadd.f32 %v1116_v46, %v1112_v44  ;;  %v1118_v48 = vpop.eup %1117 }
  0x70   : > { %697 = vadd.xlane.f32.xlu0 %v696_v43  ;;  %v1120_v50 = vpop.eup %1119 }
  0x71   : > { %v442_v49 = vadd.f32 %v1114_v45, %v441_v47 }
  0x73   : > { %v443_v51 = vadd.f32 %v1118_v48, %v442_v49 }
  0x75   : > { %v444_v52 = vadd.f32 %v1120_v50, %v443_v51 }
  0x77   : > { %1121 = vrcp.f32 %v444_v52 }
  0x78   : > { %1123 = vlog2.f32 %v444_v52 }
  0x81   : > { %v1122_v57 = vpop.eup %1121 }
  0x82   : > { %v1124_v60 = vpop.eup %1123  ;;  %v463_v61 = vmul.f32 %v1122_v57, %v1116_v46  ;;  %v480_v63 = vmul.f32 %v1122_v57, %v1112_v44  ;;  %v501_v0 = vmul.f32 %v1122_v57, %v1114_v45  ;;  %v522_v4 = vmul.f32 %v1122_v57, %v1118_v48 }
  0x83   : > { %v543_v3 = vmul.f32 %v1122_v57, %v1120_v50  ;;  %v448_v11 = vmul.f32 0.6931472, %v1124_v60 }
  0x84   : > { %v469_v12 = vadd.f32 %v468_v58, %v463_v61  ;;  %v465_v13 = vmul.f32 %v1427_v7, %v463_v61  ;;  %v488_v14 = vadd.f32 %v487_v59, %v480_v63  ;;  %v483_v17 = vmul.f32 %v1443_v15, %v480_v63 }
  0x85   : > { %v509_v21 = vadd.f32 %v508_v1, %v501_v0  ;;  %v504_v23 = vmul.f32 %v1431_v8, %v501_v0  ;;  %v530_v24 = vadd.f32 %v529_v5, %v522_v4  ;;  %v525_v25 = vmul.f32 %v1452_v20, %v522_v4 }
  0x86   : > { %470 = vst [vmem:[#allocation3] sm:$0x3] %v469_v12  ;;  %v466_v26 = vadd.f32 %v465_v13, %v464_v62  ;;  %489 = vst [vmem:[#allocation3 + $0x2] sm:$0x3] %v488_v14  ;;  %v484_v28 = vadd.f32 %v483_v17, %v482_v6  ;;  %v551_v2 = vadd.f32 %v550_v10, %v543_v3 }
  0x87   : > { %v449_v16 = vadd.f32 %v448_v11, %v1456_v22  ;;  %510 = vst [vmem:[#allocation3 + $0x4] sm:$0x3] %v509_v21  ;;  %v505_v30 = vadd.f32 %v504_v23, %v503_v18  ;;  %531 = vst [vmem:[#allocation3 + $0x6] sm:$0x3] %v530_v24  ;;  %v526_v31 = vadd.f32 %v525_v25, %v524_v19  ;;  %v591_v24 = vlaneseq }
  0x88   : > { %v546_v32 = vmul.f32 %v1467_v27, %v543_v3  ;;  %467 = vst [vmem:[#allocation2] sm:$0x3] %v466_v26  ;;  %485 = vst [vmem:[#allocation2 + $0x2] sm:$0x3] %v484_v28  ;;  %v686_v3 = vld [vmem:[#allocation4 + $0x8] sm:$0x3] }
  0x89   : > { %552 = vst [vmem:[#allocation3 + $0x8] sm:$0x3] %v551_v2  ;;  %v460_v33 = vsub.f32 %v449_v16, %v459_v9  ;;  %506 = vst [vmem:[#allocation2 + $0x4] sm:$0x3] %v505_v30  ;;  %v699_v9 = vsel %vm570_vm5, %v686_v3, 0.0  ;;  %v592_v28 = vand.u32 127, %v591_v24 }
  0x8a   : > { %527 = vst [vmem:[#allocation2 + $0x6] sm:$0x3] %v526_v31  ;;  %v547_v35 = vadd.f32 %v546_v32, %v545_v29  ;;  %v594_v2 = vshrl.u32 %v591_v24, 7 }
  0x8b   : > { %v496_v22 = vmul.f32 %v1443_v15, %v460_v33  ;;  %v475_v39 = vmul.f32 %v1427_v7, %v460_v33  ;;  %v517_v40 = vmul.f32 %v1431_v8, %v460_v33  ;;  %v538_v41 = vmul.f32 %v1452_v20, %v460_v33 }
  0x8c   : > { %548 = vst [vmem:[#allocation2 + $0x8] sm:$0x3] %v547_v35  ;;  %v559_v43 = vmul.f32 %v1467_v27, %v460_v33  ;;  %v595_v30 = vsub.s32 %v592_v28, %v594_v2 }
  0x8d   : > { %v497_v44 = vadd.f32 %v496_v22, %v495_v34  ;;  %v476_v45 = vadd.f32 %v475_v39, %v474_v36  ;;  %v518_v46 = vadd.f32 %v517_v40, %v516_v37  ;;  %v539_v47 = vadd.f32 %v538_v41, %v537_v38  ;;  %v628_v48 = vld [vmem:[#allocation3] sm:$0x3]  ;;  %v629_v49 = vld [vmem:[#allocation3 + $0x2] sm:$0x3] }
  0x8e   : > { %v560_v50 = vadd.f32 %v559_v43, %v558_v42  ;;  %v633_v51 = vsel %vm570_vm5, %v628_v48, 0.0  ;;  %v636_v20 = vsel %vm570_vm5, %v629_v49, 0.0  ;;  %v630_v27 = vld [vmem:[#allocation3 + $0x4] sm:$0x3]  ;;  %v631_v55 = vld [vmem:[#allocation3 + $0x6] sm:$0x3] }
  0x8f   : > { %498 = vst [vmem:[#allocation5 + $0x2] sm:$0x3] %v497_v44  ;;  %477 = vst [vmem:[#allocation5] sm:$0x3] %v476_v45  ;;  %634 = vadd.xlane.f32.xlu1 %v633_v51  ;;  %v565_v7 = vld [vmem:[#allocation2] sm:$0x3] }
  0x90   : > { %519 = vst [vmem:[#allocation5 + $0x4] sm:$0x3] %v518_v46  ;;  %540 = vst [vmem:[#allocation5 + $0x6] sm:$0x3] %v539_v47  ;;  %v566_v8 = vld [vmem:[#allocation2 + $0x2] sm:$0x3] }
  0x91   : > { %561 = vst [vmem:[#allocation5 + $0x8] sm:$0x3] %v560_v50  ;;  %v571_v15 = vsel %vm570_vm5, %v565_v7, 0.0  ;;  %v574_v52 = vsel %vm570_vm5, %v566_v8, 0.0  ;;  %v567_v53 = vld [vmem:[#allocation2 + $0x4] sm:$0x3] }
  0x92   : > { %572 = vadd.xlane.f32.xlu0 %v571_v15  ;;  %v639_v54 = vsel %vm570_vm5, %v630_v27, 0.0  ;;  %v577_v56 = vsel %vm570_vm5, %v567_v53, 0.0  ;;  %v568_v57 = vld [vmem:[#allocation2 + $0x6] sm:$0x3]  ;;  %v642_v58 = vsel %vm570_vm5, %v631_v55, 0.0 }
  0x93   : > { %637 = vadd.xlane.f32.xlu1 %v636_v20  ;;  %v632_v59 = vld [vmem:[#allocation3 + $0x8] sm:$0x3]  ;;  %v580_v60 = vsel %vm570_vm5, %v568_v57, 0.0  ;;  %v569_v61 = vld [vmem:[#allocation2 + $0x8] sm:$0x3] }
  0x94   : > { %v645_v62 = vsel %vm570_vm5, %v632_v59, 0.0  ;;  %v583_v0 = vsel %vm570_vm5, %v569_v61, 0.0 }
  0x96   : > { %575 = vadd.xlane.f32.xlu0 %v574_v52  ;;  %v737_v63 = vld [vmem:[#allocation5 + $0x2] sm:$0x3]  ;;  %v736_v1 = vld [vmem:[#allocation5] sm:$0x3] }
  0x97   : > { %640 = vadd.xlane.f32.xlu1 %v639_v54  ;;  %v744_v4 = vsel %vm570_vm5, %v737_v63, 0.0  ;;  %v738_v5 = vld [vmem:[#allocation5 + $0x4] sm:$0x3]  ;;  %v741_v6 = vsel %vm570_vm5, %v736_v1, 0.0  ;;  %v739_v11 = vld [vmem:[#allocation5 + $0x6] sm:$0x3] }
  0x98   : > { %v747_v10 = vsel %vm570_vm5, %v738_v5, 0.0  ;;  %v750_v12 = vsel %vm570_vm5, %v739_v11, 0.0  ;;  %v740_v13 = vld [vmem:[#allocation5 + $0x8] sm:$0x3] }
  0x99   : > { %v753_v14 = vsel %vm570_vm5, %v740_v13, 0.0 }
  0x9a   : > { %578 = vadd.xlane.f32.xlu0 %v577_v56 }
  0x9b   : > { %643 = vadd.xlane.f32.xlu1 %v642_v58 }
  0x9e   : > { %581 = vadd.xlane.f32.xlu0 %v580_v60 }
  0x9f   : > { %646 = vadd.xlane.f32.xlu1 %v645_v62 }
  0xa2   : > { %584 = vadd.xlane.f32.xlu0 %v583_v0 }
  0xa3   : > { %745 = vadd.xlane.f32.xlu1 %v744_v4 }
  0xa6   : > { %742 = vadd.xlane.f32.xlu0 %v741_v6 }
  0xa7   : > { %748 = vadd.xlane.f32.xlu1 %v747_v10 }
  0xaa   : > { %700 = vadd.xlane.f32.xlu0 %v699_v9 }
  0xab   : > { %751 = vadd.xlane.f32.xlu1 %v750_v12 }
  0xaf   : > { %754 = vadd.xlane.f32.xlu1 %v753_v14 }
  0xf3   : > { %v689_v17 = vpop.xlane.xlu0 %688 }
  0xf4   : > { %v710_v46 = vrot.slane %v689_v17, %v595_v30 }
  0xf8   : > { %v692_v19 = vpop.xlane.xlu1 %691 }
  0xf9   : > { %v695_v18 = vpop.xlane.xlu0 %694  ;;  %v714_v47 = vrot.slane %v692_v19, %v595_v30 }
  0xfa   : > { %v718_v27 = vrot.slane %v695_v18, %v595_v30 }
  0xfb   : > { %v727_v53 = vsel %vm613_vm6, %v714_v47, %v710_v46 }
  0xfc   : > { %v728_v58 = vsel %vm615_vm7, %v718_v27, %v727_v53 }
  0xfd   : > { %v698_v21 = vpop.xlane.xlu0 %697 }
  0xfe   : > { %v722_v56 = vrot.slane %v698_v21, %v595_v30 }
 0x100   : > { %v729_v0 = vsel %vm617_vm9, %v722_v56, %v728_v58 }
 0x11c   : > { %v635_v23 = vpop.xlane.xlu1 %634 }
 0x11d   : > { %v656_v37 = vrot.slane %v635_v23, %v595_v30 }
 0x11f   : > { %v573_v25 = vpop.xlane.xlu0 %572 }
 0x120   : > { %v638_v26 = vpop.xlane.xlu1 %637  ;;  %v596_v32 = vrot.slane %v573_v25, %v595_v30 }
 0x121   : > { %v660_v33 = vrot.slane %v638_v26, %v595_v30 }
 0x123   : > { %v576_v16 = vpop.xlane.xlu0 %575  ;;  %v673_v40 = vsel %vm613_vm6, %v660_v33, %v656_v37 }
 0x124   : > { %v641_v29 = vpop.xlane.xlu1 %640  ;;  %v600_v34 = vrot.slane %v576_v16, %v595_v30 }
 0x125   : > { %v664_v36 = vrot.slane %v641_v29, %v595_v30 }
 0x126   : > { %v614_v41 = vsel %vm613_vm6, %v600_v34, %v596_v32 }
 0x127   : > { %v579_v31 = vpop.xlane.xlu0 %578  ;;  %v674_v44 = vsel %vm615_vm7, %v664_v36, %v673_v40 }
 0x128   : > { %v644_v35 = vpop.xlane.xlu1 %643  ;;  %v604_v39 = vrot.slane %v579_v31, %v595_v30 }
 0x129   : > { %v668_v38 = vrot.slane %v644_v35, %v595_v30 }
 0x12a   : > { %v616_v50 = vsel %vm615_vm7, %v604_v39, %v614_v41 }
 0x12b   : > { %v582_v22 = vpop.xlane.xlu0 %581  ;;  %v675_v49 = vsel %vm617_vm9, %v668_v38, %v674_v44 }
 0x12c   : > { %v608_v42 = vrot.slane %v582_v22, %v595_v30  ;;  %v647_v43 = vpop.xlane.xlu1 %646 }
 0x12d   : > { %v672_v45 = vrot.slane %v647_v43, %v595_v30 }
 0x12e   : > { %v618_v20 = vsel %vm617_vm9, %v608_v42, %v616_v50 }
 0x12f   : > { %v585_v48 = vpop.xlane.xlu0 %584  ;;  %v676_v7 = vsel %vm619_vm8, %v672_v45, %v675_v49 }
 0x130   : > { %v612_v51 = vrot.slane %v585_v48, %v595_v30  ;;  %v746_v8 = vpop.xlane.xlu1 %745  ;;  %v678_v15 = vsel %vm622_vm10, %v676_v7, 0.0 }
 0x131   : > { %679 = vadd.xlane.f32.xlu1 %v678_v15  ;;  %v768_v62 = vrot.slane %v746_v8, %v595_v30 }
 0x132   : > { %v620_v52 = vsel %vm619_vm8, %v612_v51, %v618_v20 }
 0x133   : > { %v743_v54 = vpop.xlane.xlu0 %742  ;;  %v623_v55 = vsel %vm622_vm10, %v620_v52, 0.0 }
 0x134   : > { %624 = vadd.xlane.f32.xlu0 %v623_v55  ;;  %v749_v57 = vpop.xlane.xlu1 %748  ;;  %v764_v59 = vrot.slane %v743_v54, %v595_v30 }
 0x135   : > { %v772_v1 = vrot.slane %v749_v57, %v595_v30 }
 0x136   : > { %v781_v5 = vsel %vm613_vm6, %v768_v62, %v764_v59 }
 0x137   : > { %v701_v60 = vpop.xlane.xlu0 %700  ;;  %v782_v11 = vsel %vm615_vm7, %v772_v1, %v781_v5 }
 0x138   : > { %v726_v61 = vrot.slane %v701_v60, %v595_v30  ;;  %v752_v63 = vpop.xlane.xlu1 %751 }
 0x139   : > { %v776_v6 = vrot.slane %v752_v63, %v595_v30 }
 0x13a   : > { %v730_v4 = vsel %vm619_vm8, %v726_v61, %v729_v0 }
 0x13b   : > { %v732_v3 = vsel %vm622_vm10, %v730_v4, 0.0  ;;  %v783_v12 = vsel %vm617_vm9, %v776_v6, %v782_v11 }
 0x13c   : > { %733 = vadd.xlane.f32.xlu0 %v732_v3  ;;  %v755_v10 = vpop.xlane.xlu1 %754 }
 0x13d   : > { %v780_v9 = vrot.slane %v755_v10, %v595_v30 }
 0x13f   : > { %v784_v13 = vsel %vm619_vm8, %v780_v9, %v783_v12 }
 0x140   : > { %v786_v14 = vsel %vm622_vm10, %v784_v13, 0.0 }
 0x141   : > { %787 = vadd.xlane.f32.xlu1 %v786_v14 }
 0x1be   : > { %v680_v17 = vpop.xlane.xlu1 %679 }
 0x1bf   : > { %681 = vst.msk [vmem:[%s377_s6] sm:$0x1f] %vm626_vm11, %v680_v17 }
 0x1c1   : > { %v625_v18 = vpop.xlane.xlu0 %624 }
 0x1c2   : > { %627 = vst.msk [vmem:[%s370_s12] sm:$0x1f] %vm626_vm11, %v625_v18 }
 0x1c9   : > { %v734_v19 = vpop.xlane.xlu0 %733 }
 0x1ca   : > { %735 = vst.msk [vmem:[%s384_s17] sm:$0x1f] %vm626_vm11, %v734_v19 }
 0x1ce   : > { %v788_v21 = vpop.xlane.xlu1 %787 }
 0x1cf   : > { %789 = vst.msk [vmem:[%s391_s26] sm:$0x1f] %vm626_vm11, %v788_v21 }
 0x1d0 PF: > { %s22_s23 = sadd.s32 1, %s1239_s23   ;;  %s1582_s18 = smov %s1223_s19 }
 0x1d1   : > { %p19_p9 = scmp.ge.s32.totalorder %s22_s23, 4   ;;  %s1583_s19 = smov %s1227_s20 }
 0x1d2   : > { %s1584_s20 = smov %s1321_s29  ;;  %s1585_s21 = smov %s1235_s22 }
 0x1d3   : > { %s1586_s22 = smov %s1588_s25  ;;  %21 = sbr.rel (!%p19_p9) target bundleno = 6 (0x6), region = 141 }
 0x1da   :  { %875 = vsyncpa [#allocation7], 1 }
 0x1db   :  { %877 = vsyncpa [#allocation7 + $0x1], 1 }
 0x1dc   :  { %878 = vsyncpa [#allocation9], 1 }
 0x1dd   :  { %880 = vsyncpa [#allocation9 + $0x1], 1 }

</bundles_post_ra>
